<compile_context>
chip_gen: v7x
topology: tpu7x:2x2x1
jax: 0.10.0
libtpu: 0.0.40
codegen_flags: <defaults>
</compile_context>

<pallas_src>
import jax
import jax.numpy as jnp
from jax.experimental import pallas as pl
from jax.experimental.pallas import tpu as pltpu

_LANES = 128


def _modrelu_kernel(bias_ref, x_ref, o_ref):
    # bias_ref: (1,) f32 scalar in SMEM; x_ref / o_ref: (tr, tc) VMEM tiles.
    x = x_ref[...]
    b = bias_ref[0].astype(x.dtype)
    o_ref[...] = jnp.maximum(x + b, 0).astype(o_ref.dtype)


def _round_up(a: int, m: int) -> int:
    return ((a + m - 1) // m) * m


_NUM_TC_CACHE = None


def _tensorcores_per_device() -> int:
    """Best-effort TensorCore count per JAX device (2 on megacore chips)."""
    global _NUM_TC_CACHE
    if _NUM_TC_CACHE is not None:
        return _NUM_TC_CACHE
    cores = 1
    try:
        info = pltpu.get_tpu_info()
        for name in ("num_cores", "num_cores_per_chip", "tensorcores_per_chip",
                     "core_count", "num_tensorcores"):
            v = getattr(info, name, None)
            if isinstance(v, int) and 1 <= v <= 8:
                cores = v
                break
    except Exception:
        pass
    if cores == 1:
        try:
            kind = jax.devices()[0].device_kind.lower()
            if any(tag in kind for tag in ("v4", "v5p", "v7")):
                cores = 2
        except Exception:
            pass
    _NUM_TC_CACHE = cores
    return cores


def _run_modrelu_2d(x2d: jnp.ndarray, bias_arr: jnp.ndarray,
                    *, target_block_bytes: int = 4 * 1024 * 1024) -> jnp.ndarray:
    rows, width = x2d.shape
    itemsize = jnp.dtype(x2d.dtype).itemsize
    # Sublane granularity is dtype dependent: 8 (4-byte) / 16 (bf16) / 32 (1-byte).
    sub = max(8, 32 // itemsize)
    cores = _tensorcores_per_device()

    max_block_elems = max(target_block_bytes // itemsize, sub * _LANES)

    # Lane (last-dim) blocking: keep the full row when it fits the block budget
    # at the minimum sublane height; otherwise tile in 128-lane multiples
    # (the ragged final lane block is masked by Pallas on writeback).
    width_padded = _round_up(width, _LANES)          # VMEM lane padding
    if width_padded * sub <= max_block_elems:
        tc, tc_padded = width, width_padded
    else:
        tc = max(_LANES, (max_block_elems // sub) // _LANES * _LANES)
        tc_padded = tc
    gc = pl.cdiv(width, tc)

    # Row (second-minor) blocking: target ~4 MiB blocks, near-equal sizes.
    tr_budget = max(sub, (max_block_elems // tc_padded) // sub * sub)
    if rows <= tr_budget:
        if cores >= 2 and gc == 1 and rows >= 2 * sub:
            # Split small tensors in two only on 2-TC chips (v7x/v4/v5p) so
            # both TensorCores get work; single-TC chips keep one block.
            tr = _round_up(-(-rows // 2), sub)
        else:
            tr = rows                                # full-extent block
    else:
        gr0 = pl.cdiv(rows, tr_budget)
        if cores >= 2 and gc == 1 and gr0 % 2 == 1 and gr0 < 16:
            gr0 += 1                                 # even step count for 2 TCs
        tr = _round_up(-(-rows // gr0), sub)         # near-equal block sizes
    gr = pl.cdiv(rows, tr)
    grid = (gr, gc)

    cost = pl.CostEstimate(
        flops=2 * rows * width,                      # add + max per element
        transcendentals=0,
        bytes_accessed=2 * rows * width * itemsize,  # read x + write out
    )

    return pl.pallas_call(
        _modrelu_kernel,
        out_shape=jax.ShapeDtypeStruct((rows, width), x2d.dtype),
        grid_spec=pltpu.PrefetchScalarGridSpec(
            num_scalar_prefetch=0,
            grid=grid,
            in_specs=[
                # (1,) f32 bias, resident in SMEM (no recompile per bias value).
                pl.BlockSpec(memory_space=pltpu.MemorySpace.SMEM),
                pl.BlockSpec((tr, tc), lambda i, j: (i, j)),
            ],
            out_specs=pl.BlockSpec((tr, tc), lambda i, j: (i, j)),
        ),
        compiler_params=pltpu.CompilerParams(
            dimension_semantics=("parallel", "parallel"),
            vmem_limit_bytes=32 * 1024 * 1024,
        ),
        cost_estimate=cost,
        # TODO(synk): add input_output_aliases={1: 0} once callers donate x at
        # the jit boundary; without donation XLA would insert a defensive copy.
    )(bias_arr, x2d)


def mod_relu(x: jnp.ndarray, bias: float = -0.1) -> jnp.ndarray:
    """ReLU(x + bias) with bias < 0, computed in a Pallas TPU kernel."""
    assert bias < 0, "bias must be smaller than 0 to have a non-linearity effect"
    assert jnp.issubdtype(x.dtype, jnp.floating), (
        "_modReLU expects a real-valued floating point magnitude tensor")

    orig_shape = x.shape
    n = x.size
    if n == 0:
        return x

    bias_arr = jnp.asarray([bias], dtype=jnp.float32)

    if n % _LANES == 0:
        # Zero-copy path: reshape to a lane-dense slab. Prefer the widest lane
        # width (<= 4096) that still leaves >= 8 sublane rows.
        width = _LANES
        for cand in (4096, 2048, 1024, 512, 256):
            if n % cand == 0 and n // cand >= 8:
                width = cand
                break
        x2d = x.reshape(n // width, width)
    else:
        # Ragged size (n % 128 != 0): NO pad / slice. Collapse trailing dims
        # into a full-extent lane axis (any width is legal as a full-extent
        # block dim) and leading dims into rows; Pallas masks the ragged final
        # block on writeback, keeping HBM traffic at the 2N-byte ideal.
        shape = orig_shape if x.ndim >= 1 else (1,)
        width = 1
        for d in reversed(shape):
            if width * d <= 8192:
                width *= d
            else:
                break
        if width == 1:
            width = shape[-1]   # single huge trailing dim; lane-tiled in _run
        x2d = x.reshape(n // width, width)

    out2d = _run_modrelu_2d(x2d, bias_arr)
    return out2d.reshape(orig_shape)


if __name__ == "__main__":
    key = jax.random.PRNGKey(0)
    bias = -0.5  # module hyperparameter, must be < 0

    # Primary example: NCHW magnitude tensor (batch=2, channels=4, 16x16).
    x = jax.random.normal(key, (2, 4, 16, 16), dtype=jnp.float32)
    y = jax.block_until_ready(mod_relu(x, bias=bias))
    y_ref = jnp.maximum(x + bias, 0.0)
    assert y.shape == x.shape and y.dtype == x.dtype
    assert jnp.allclose(y, y_ref, atol=1e-6), "mismatch vs reference (main)"

    # Larger aligned tensor (lane-dense width=4096 path).
    x2 = jax.random.normal(jax.random.PRNGKey(1), (2, 4, 128, 128), dtype=jnp.float32)
    y2 = jax.block_until_ready(mod_relu(x2, bias=bias))
    assert jnp.allclose(y2, jnp.maximum(x2 + bias, 0.0), atol=1e-6), "mismatch (aligned)"

    # Ragged size (n % 128 != 0): zero-copy full-extent-lane path, no pad/slice.
    x3 = jax.random.normal(jax.random.PRNGKey(2), (3, 5, 7), dtype=jnp.float32)
    y3 = jax.block_until_ready(mod_relu(x3, bias=bias))
    assert jnp.allclose(y3, jnp.maximum(x3 + bias, 0.0), atol=1e-6), "mismatch (ragged)"

    # Multi-block grid with a ragged final row block (small block override).
    x4 = jax.random.normal(jax.random.PRNGKey(3), (75, 512), dtype=jnp.float32)
    b4 = jnp.asarray([bias], dtype=jnp.float32)
    y4 = jax.block_until_ready(
        _run_modrelu_2d(x4, b4, target_block_bytes=64 * 1024))
    assert jnp.allclose(y4, jnp.maximum(x4 + bias, 0.0), atol=1e-6), "mismatch (tiled)"

    # bfloat16 path (16-row sublane granularity).
    x5 = jax.random.normal(jax.random.PRNGKey(4), (4, 256), dtype=jnp.bfloat16)
    y5 = jax.block_until_ready(mod_relu(x5, bias=bias))
    assert jnp.allclose(y5.astype(jnp.float32),
                        jnp.maximum(x5 + jnp.bfloat16(bias), 0).astype(jnp.float32),
                        atol=1e-2), "mismatch (bf16)"

    print("KERNEL_OK")
</pallas_src>

<mosaic_0001>
module attributes {stable_mosaic.version = 11 : i64} {
  func.func @_modrelu_kernel(%arg0: i32, %arg1: i32, %arg2: memref<1xf32, #tpu.memory_space<smem>>, %arg3: memref<8x256xf32, #tpu.memory_space<vmem>>, %arg4: memref<8x256xf32, #tpu.memory_space<vmem>>) attributes {dimension_semantics = [#tpu.dimension_semantics<parallel>, #tpu.dimension_semantics<parallel>], iteration_bounds = array<i64: 1, 1>, scalar_prefetch = 0 : i64, scratch_operands = 0 : i64, tpu.core_type = #tpu.core_type<tc>, window_params = [{transform_indices = @transform_0, window_bounds = array<i64: 1>}, {transform_indices = @transform_1, window_bounds = array<i64: 8, 256>}, {transform_indices = @transform_2, window_bounds = array<i64: 8, 256>}]} {
    %c0 = arith.constant 0 : index
    %c0_0 = arith.constant 0 : index
    %0 = vector.load %arg3[%c0, %c0_0] : memref<8x256xf32, #tpu.memory_space<vmem>>, vector<8x256xf32>
    %c0_1 = arith.constant 0 : index
    %1 = memref.load %arg2[%c0_1] : memref<1xf32, #tpu.memory_space<smem>>
    %2 = vector.broadcast %1 : f32 to vector<8x256xf32>
    %3 = arith.addf %0, %2 : vector<8x256xf32>
    %cst = arith.constant 0.000000e+00 : f32
    %4 = vector.broadcast %cst : f32 to vector<8x256xf32>
    %5 = arith.maximumf %3, %4 : vector<8x256xf32>
    %c0_2 = arith.constant 0 : index
    %c0_3 = arith.constant 0 : index
    %6 = vector.load %arg4[%c0_2, %c0_3] : memref<8x256xf32, #tpu.memory_space<vmem>>, vector<8x256xf32>
    tpu.vector_store %arg4[%c0_2, %c0_3], %5 {strides = array<i32>} : memref<8x256xf32, #tpu.memory_space<vmem>>, vector<8x256xf32>,
    return
  }
  func.func @transform_0(%arg0: i32, %arg1: i32) -> i32 {
    %c0_i32 = arith.constant 0 : i32
    %c0_i32_0 = arith.constant 0 : i32
    return %c0_i32 : i32
  }
  func.func @transform_1(%arg0: i32, %arg1: i32) -> (i32, i32) {
    %c0_i32 = arith.constant 0 : i32
    return %arg0, %arg1 : i32, i32
  }
  func.func @transform_2(%arg0: i32, %arg1: i32) -> (i32, i32) {
    %c0_i32 = arith.constant 0 : i32
    return %arg0, %arg1 : i32, i32
  }
}

</mosaic_0001>

<bundles_post_ra>
// kernel: tpu_custom_call.1
= control target key start
LH: loop header
LB: loop body
LE: loop exit
PB: predicated region body
PF: predicated region fallthrough
CT: control target
= control target key end

     0   :  { %8 = vsyncpa [#allocation4], 0  ;;  %s144_s0 = inlined_call_operand.<no memory space> [shape: f32[1], index: 0, kind: input, shape index: {}]   ;;  %s145_s1 = inlined_call_operand.hbm [shape: f32[8,256], index: 1, kind: input, shape index: {}]   ;;  %s146_s2 = inlined_call_operand.hbm [shape: f32[8,256], index: 2, kind: output, shape index: {}]  }
   0x1   :  { %9 = vsyncpa [#allocation5], 0  ;;  %s100_s9 = smov [#allocation3]   ;;  %s52_s13 = scalar_lea.hbm %s145_s1, 256 }
   0x2   :  { %s18_s10 = sshll.u32 %s100_s9, 4  ;;  %p53_p0 = scmp.ne.s32.totalorder %s145_s1, %s52_s13  ;;  %s19_s10 = int_to_ptr.vmem [resolvable:$true] %s18_s10 }
   0x3   :  { %p56_p1 = scmp.lt.u32.totalorder %s52_s13, %s145_s1 }
   0x5   :  { %p58_p2 = pnand %p56_p1, %p53_p0 }
   0x7   :  { %61 = shalt.err (!%p58_p2)
}
   0x8   :  { %s62_s18 = scalar_lea.vmem %s19_s10, 256  ;;  %p67_p4 = scmp.lt.s32.totalorder %s19_s10, %s19_s10 }
   0x9   :  { %p63_p3 = scmp.ne.s32.totalorder %s19_s10, %s62_s18  ;;  %p68_p5 = scmp.lt.s32.totalorder %s62_s18, %s62_s18 }
   0xb   :  { %p69_p6 = por %p68_p5, %p67_p4 }
   0xd   :  { %p70_p7 = pnand %p69_p6, %p63_p3 }
   0xf   :  { %73 = shalt.err (!%p70_p7)
}
  0x10   :  { %21 = dma.hbm_to_vmem [thread:$0]  %s145_s1, 256, %s19_s10, [#allocation4]  }
  0x11   :  { %96 = dma.done.wait [#allocation4], 256  }
  0x12   :  { %97 = vsyncadd [#allocation4], 4294967040  ;;  %v28_v0 = vstv %s144_s0  ;;  %v25_v1 = vld [vmem:[#allocation3] sm:$0xff]  ;;  %v26_v2 = vld [vmem:[#allocation3 + $0x8] sm:$0xff]  ;;  %s101_s23 = smov [#allocation6]  }
  0x13   :  { %s41_s24 = sshll.u32 %s101_s23, 4  ;;  %v29_v3 = vadd.f32 %v28_v0, %v25_v1  ;;  %v30_v4 = vadd.f32 %v28_v0, %v26_v2  ;;  %s42_s24 = int_to_ptr.vmem [resolvable:$true] %s41_s24 }
  0x14   :  { %s74_s25 = scalar_lea.vmem %s42_s24, 256  ;;  %p79_p9 = scmp.lt.s32.totalorder %s42_s24, %s42_s24 }
  0x15   :  { %v31_v5 = vmax.f32 %v29_v3, 0.0  ;;  %v32_v6 = vmax.f32 %v30_v4, 0.0  ;;  %p75_p8 = scmp.ne.s32.totalorder %s42_s24, %s74_s25  ;;  %p80_p10 = scmp.lt.s32.totalorder %s74_s25, %s74_s25 }
  0x17   :  { %33 = vst [vmem:[#allocation6] sm:$0xff] %v31_v5  ;;  %34 = vst [vmem:[#allocation6 + $0x8] sm:$0xff] %v32_v6  ;;  %p81_p11 = por %p80_p10, %p79_p9 }
  0x19   :  { %p82_p12 = pnand %p81_p11, %p75_p8 }
  0x1b   :  { %85 = shalt.err (!%p82_p12)
}
  0x1c   :  { %s86_s26 = scalar_lea.hbm %s146_s2, 256 }
  0x1d   :  { %p87_p13 = scmp.ne.s32.totalorder %s146_s2, %s86_s26  ;;  %p90_p0 = scmp.lt.u32.totalorder %s86_s26, %s146_s2 }
  0x1f   :  { %p92_p1 = pnand %p90_p0, %p87_p13 }
  0x21   :  { %95 = shalt.err (!%p92_p1)
}
  0x22   :  { %44 = dma.vmem_to_hbm [thread:$0]  %s42_s24, 256, %s146_s2, [#allocation5]  }
  0x23   :  { %98 = dma.done.wait [#allocation5], 256  }
  0x24   :  { %99 = vsyncadd [#allocation5], 4294967040 }
  0x25   :  { %48 = vsyncpa [#allocation4], 1 }
  0x26   :  { %49 = vsyncpa [#allocation5], 1 }

</bundles_post_ra>
